<compile_context>
chip_gen: v7x
topology: tpu7x:2x2x1
jax: 0.10.0
libtpu: 0.0.40
codegen_flags: <defaults>
</compile_context>

<pallas_src>
import functools

import jax
import jax.numpy as jnp
from jax import lax
from jax.experimental import pallas as pl
from jax.experimental.pallas import tpu as pltpu

_LANES = 128


def _round_up(x, m):
    return ((x + m - 1) // m) * m


def _nll_kernel(logit_ref, status_ref, out_ref,
                tri_ref, low_ref, carry_ref, acc_ref,
                *, n_valid, reduction, block_rows):
    step = pl.program_id(0)

    @pl.when(step == 0)
    def _init():
        # Inclusive upper-triangular (128,128): U[j, c] = 1 if j <= c, so that
        # (E @ U)[r, c] = sum_{j <= c} E[r, j]   (prefix sum along lanes).
        rj = lax.broadcasted_iota(jnp.int32, (_LANES, _LANES), 0)
        cc = lax.broadcasted_iota(jnp.int32, (_LANES, _LANES), 1)
        tri_ref[...] = (rj <= cc).astype(jnp.float32)
        # Strictly-lower (block_rows, block_rows): L[i, j] = 1 if j < i, so that
        # (L @ t)[i] = sum_{j < i} t[j]          (exclusive prefix over rows).
        ri = lax.broadcasted_iota(jnp.int32, (block_rows, block_rows), 0)
        cj = lax.broadcasted_iota(jnp.int32, (block_rows, block_rows), 1)
        low_ref[...] = (cj < ri).astype(jnp.float32)
        carry_ref[...] = jnp.zeros_like(carry_ref)
        acc_ref[...] = jnp.zeros_like(acc_ref)

    x = logit_ref[...]          # (block_rows, 128) max-subtracted logits, pad = -1e30
    s = status_ref[...]         # (block_rows, 128) event indicator,      pad = 0

    e = jnp.exp(x)              # padded entries -> exp(-1e30) == 0

    # Intra-row inclusive prefix sum along the lane axis (full-width MXU matmul).
    lane_prefix = jnp.dot(e, tri_ref[...], preferred_element_type=jnp.float32)
    # Per-row totals and exclusive prefix over rows within this block.
    row_total = jnp.sum(e, axis=-1, keepdims=True)                      # (block_rows, 1)
    row_carry = jnp.dot(low_ref[...], row_total,
                        preferred_element_type=jnp.float32)             # (block_rows, 1)

    carry_in = carry_ref[...]                                           # (1, 1)
    csum = lane_prefix + row_carry + carry_in                           # (block_rows, 128)

    log_risk_delta = x - jnp.log(csum)
    acc_ref[...] = acc_ref[...] + jnp.sum(log_risk_delta * s, keepdims=True)
    carry_ref[...] = carry_in + jnp.sum(row_total, keepdims=True)

    @pl.when(step == pl.num_programs(0) - 1)
    def _finish():
        total = -acc_ref[...]
        if reduction == "sum":
            out_ref[...] = total
        else:  # 'mean' (torch .mean() over all N samples, matching the module)
            out_ref[...] = total / jnp.float32(n_valid)


def negative_log_likelihood(logit, status_time, reduction="mean", block_rows=512):
    """JAX/Pallas equivalent of NegativeLogLikelihood.forward.

    logit:        (N,) or (N, 1) float — model scores.
    status_time:  (N, 2) float — column 0 = event status, column 1 = time.
    """
    logit = jnp.asarray(logit, jnp.float32).reshape(-1)                 # squeeze -> (N,)
    status = status_time[:, 0].astype(jnp.float32)
    time = status_time[:, 1]
    n = logit.shape[0]

    # torch.argsort(time, descending=True) + gather: plain-JAX glue.
    # TODO(synk): sorting itself has no clean Pallas/TPU-kernel equivalent.
    index = jnp.argsort(-time)
    x = logit[index]
    s = status[index]

    # Stabilize: x - log(cumsum(exp(x))) == y - log(cumsum(exp(y))), y = x - max(x).
    y = x - jnp.max(x)

    rows_needed = max(-(-n // _LANES), 1)
    br = min(block_rows, _round_up(rows_needed, 8))      # rows per grid step (mult. of 8)
    rows = _round_up(rows_needed, br)                    # total padded rows
    padded = rows * _LANES

    y_p = jnp.full((padded,), -1e30, jnp.float32).at[:n].set(y).reshape(rows, _LANES)
    s_p = jnp.zeros((padded,), jnp.float32).at[:n].set(s).reshape(rows, _LANES)

    kernel = functools.partial(_nll_kernel, n_valid=n, reduction=reduction,
                               block_rows=br)
    out = pl.pallas_call(
        kernel,
        out_shape=jax.ShapeDtypeStruct((1, 1), jnp.float32),
        grid_spec=pltpu.PrefetchScalarGridSpec(
            num_scalar_prefetch=0,
            grid=(rows // br,),
            in_specs=[
                pl.BlockSpec((br, _LANES), lambda i: (i, 0)),
                pl.BlockSpec((br, _LANES), lambda i: (i, 0)),
            ],
            out_specs=pl.BlockSpec((1, 1), lambda i: (0, 0)),
            scratch_shapes=[
                pltpu.VMEM((_LANES, _LANES), jnp.float32),   # upper-tri lane mask
                pltpu.VMEM((br, br), jnp.float32),           # strictly-lower row mask
                pltpu.VMEM((1, 1), jnp.float32),             # running exp-sum carry
                pltpu.VMEM((1, 1), jnp.float32),             # loss accumulator
            ],
        ),
        compiler_params=pltpu.CompilerParams(
            dimension_semantics=("arbitrary",)),
    )(y_p, s_p)
    return out[0, 0]


def _reference(logit, status_time, reduction="mean"):
    status, time = status_time[:, 0], status_time[:, 1]
    logit = jnp.asarray(logit, jnp.float32).reshape(-1)
    idx = jnp.argsort(-time)
    logit, status = logit[idx], status[idx].astype(jnp.float32)
    log_risk_delta = logit - jnp.log(jnp.cumsum(jnp.exp(logit)))
    censored_risk = log_risk_delta * status
    if reduction == "sum":
        return -jnp.sum(censored_risk)
    return -jnp.mean(censored_risk)


if __name__ == "__main__":
    # Small case matching the module's typical call signature.
    k1, k2, k3 = jax.random.split(jax.random.PRNGKey(0), 3)
    N = 16
    logit = jax.random.normal(k1, (N, 1), dtype=jnp.float32)             # model output
    status = (jax.random.uniform(k2, (N,)) > 0.5).astype(jnp.float32)    # event indicator
    time = jax.random.uniform(k3, (N,), dtype=jnp.float32) * 100.0       # survival time
    status_time = jnp.stack([status, time], axis=1)                      # (N, 2)

    loss_mean = negative_log_likelihood(logit, status_time, reduction="mean")
    loss_sum = negative_log_likelihood(logit, status_time, reduction="sum")
    jax.block_until_ready((loss_mean, loss_sum))
    assert jnp.allclose(loss_mean, _reference(logit, status_time, "mean"),
                        rtol=1e-5, atol=1e-5)
    assert jnp.allclose(loss_sum, _reference(logit, status_time, "sum"),
                        rtol=1e-5, atol=1e-5)

    # Larger case with a small block size to exercise the multi-step grid carry.
    k4, k5, k6 = jax.random.split(jax.random.PRNGKey(1), 3)
    N2 = 3000
    logit2 = jax.random.normal(k4, (N2, 1), dtype=jnp.float32)
    status2 = (jax.random.uniform(k5, (N2,)) > 0.5).astype(jnp.float32)
    time2 = jax.random.uniform(k6, (N2,), dtype=jnp.float32) * 100.0
    status_time2 = jnp.stack([status2, time2], axis=1)

    loss2_mean = negative_log_likelihood(logit2, status_time2, reduction="mean",
                                         block_rows=8)
    loss2_sum = negative_log_likelihood(logit2, status_time2, reduction="sum",
                                        block_rows=8)
    jax.block_until_ready((loss2_mean, loss2_sum))
    assert jnp.allclose(loss2_mean, _reference(logit2, status_time2, "mean"),
                        rtol=1e-4, atol=1e-4)
    assert jnp.allclose(loss2_sum, _reference(logit2, status_time2, "sum"),
                        rtol=1e-4, atol=1e-4)

    print("KERNEL_OK")
</pallas_src>

<mosaic_0001>
module attributes {stable_mosaic.version = 11 : i64} {
  func.func @_nll_kernel(%arg0: i32, %arg1: memref<8x128xf32, #tpu.memory_space<vmem>>, %arg2: memref<8x128xf32, #tpu.memory_space<vmem>>, %arg3: memref<1x1xf32, #tpu.memory_space<vmem>>, %arg4: memref<128x128xf32, #tpu.memory_space<vmem>>, %arg5: memref<8x8xf32, #tpu.memory_space<vmem>>, %arg6: memref<1x1xf32, #tpu.memory_space<vmem>>, %arg7: memref<1x1xf32, #tpu.memory_space<vmem>>) attributes {dimension_semantics = [#tpu.dimension_semantics<arbitrary>], iteration_bounds = array<i64: 1>, scalar_prefetch = 0 : i64, scratch_operands = 4 : i64, tpu.core_type = #tpu.core_type<tc>, window_params = [{transform_indices = @transform_0, window_bounds = array<i64: 8, 128>}, {transform_indices = @transform_1, window_bounds = array<i64: 8, 128>}, {pipeline_mode = #tpu.pipeline_mode<synchronous>, transform_indices = @transform_2, window_bounds = array<i64: 1, 1>}]} {
    %c0_i32 = arith.constant 0 : i32
    %0 = arith.cmpi eq, %arg0, %c0_i32 : i32
    %1 = arith.extui %0 : i1 to i32
    %c0_i32_0 = arith.constant 0 : i32
    %2 = arith.cmpi ne, %1, %c0_i32_0 : i32
    scf.if %2 {
      %38 = tpu.iota {dimensions = array<i32: 0>} : vector<128x128xi32>
      %39 = tpu.iota {dimensions = array<i32: 1>} : vector<128x128xi32>
      %40 = arith.cmpi sle, %38, %39 : vector<128x128xi32>
      %41 = arith.extui %40 : vector<128x128xi1> to vector<128x128xi32>
      %42 = arith.sitofp %41 : vector<128x128xi32> to vector<128x128xf32>
      %c0_22 = arith.constant 0 : index
      %c0_23 = arith.constant 0 : index
      %43 = vector.load %arg4[%c0_22, %c0_23] : memref<128x128xf32, #tpu.memory_space<vmem>>, vector<128x128xf32>
      tpu.vector_store %arg4[%c0_22, %c0_23], %42 {strides = array<i32>} : memref<128x128xf32, #tpu.memory_space<vmem>>, vector<128x128xf32>,
      %44 = tpu.iota {dimensions = array<i32: 0>} : vector<8x8xi32>
      %45 = tpu.iota {dimensions = array<i32: 1>} : vector<8x8xi32>
      %46 = arith.cmpi slt, %45, %44 : vector<8x8xi32>
      %47 = arith.extui %46 : vector<8x8xi1> to vector<8x8xi32>
      %48 = arith.sitofp %47 : vector<8x8xi32> to vector<8x8xf32>
      %c0_24 = arith.constant 0 : index
      %c0_25 = arith.constant 0 : index
      %49 = vector.load %arg5[%c0_24, %c0_25] : memref<8x8xf32, #tpu.memory_space<vmem>>, vector<8x8xf32>
      tpu.vector_store %arg5[%c0_24, %c0_25], %48 {strides = array<i32>} : memref<8x8xf32, #tpu.memory_space<vmem>>, vector<8x8xf32>,
      %cst_26 = arith.constant 0.000000e+00 : f32
      %50 = vector.broadcast %cst_26 : f32 to vector<1x1xf32>
      %c0_27 = arith.constant 0 : index
      %c0_28 = arith.constant 0 : index
      %51 = vector.load %arg6[%c0_27, %c0_28] : memref<1x1xf32, #tpu.memory_space<vmem>>, vector<1x1xf32>
      tpu.vector_store %arg6[%c0_27, %c0_28], %50 {strides = array<i32>} : memref<1x1xf32, #tpu.memory_space<vmem>>, vector<1x1xf32>,
      %cst_29 = arith.constant 0.000000e+00 : f32
      %52 = vector.broadcast %cst_29 : f32 to vector<1x1xf32>
      %c0_30 = arith.constant 0 : index
      %c0_31 = arith.constant 0 : index
      %53 = vector.load %arg7[%c0_30, %c0_31] : memref<1x1xf32, #tpu.memory_space<vmem>>, vector<1x1xf32>
      tpu.vector_store %arg7[%c0_30, %c0_31], %52 {strides = array<i32>} : memref<1x1xf32, #tpu.memory_space<vmem>>, vector<1x1xf32>,
    } else {
    }
    %c0 = arith.constant 0 : index
    %c0_1 = arith.constant 0 : index
    %3 = vector.load %arg1[%c0, %c0_1] : memref<8x128xf32, #tpu.memory_space<vmem>>, vector<8x128xf32>
    %c0_2 = arith.constant 0 : index
    %c0_3 = arith.constant 0 : index
    %4 = vector.load %arg2[%c0_2, %c0_3] : memref<8x128xf32, #tpu.memory_space<vmem>>, vector<8x128xf32>
    %5 = math.exp %3 : vector<8x128xf32>
    %c0_4 = arith.constant 0 : index
    %c0_5 = arith.constant 0 : index
    %6 = vector.load %arg4[%c0_4, %c0_5] : memref<128x128xf32, #tpu.memory_space<vmem>>, vector<128x128xf32>
    %cst = arith.constant dense<0.000000e+00> : vector<8x128xf32>
    %7 = tpu.matmul %5, %6, %cst {dimension_numbers = #tpu.dot_dimension_numbers<[1], [0], [0], [1], [0, 0, 1, 1], [], []>} : vector<8x128xf32>, vector<128x128xf32>, vector<8x128xf32> -> vector<8x128xf32>
    %cst_6 = arith.constant dense<0.000000e+00> : vector<8xf32>
    %8 = vector.multi_reduction <add>, %5, %cst_6 [1] : vector<8x128xf32> to vector<8xf32>
    %9 = vector.shape_cast %8 : vector<8xf32> to vector<8x1xf32>
    %c0_7 = arith.constant 0 : index
    %c0_8 = arith.constant 0 : index
    %10 = vector.load %arg5[%c0_7, %c0_8] : memref<8x8xf32, #tpu.memory_space<vmem>>, vector<8x8xf32>
    %cst_9 = arith.constant dense<0.000000e+00> : vector<8x1xf32>
    %11 = tpu.matmul %10, %9, %cst_9 {dimension_numbers = #tpu.dot_dimension_numbers<[1], [0], [0], [1], [0, 0, 1, 1], [], []>} : vector<8x8xf32>, vector<8x1xf32>, vector<8x1xf32> -> vector<8x1xf32>
    %c0_10 = arith.constant 0 : index
    %c0_11 = arith.constant 0 : index
    %12 = vector.load %arg6[%c0_10, %c0_11] : memref<1x1xf32, #tpu.memory_space<vmem>>, vector<1x1xf32>
    %13 = vector.broadcast %11 : vector<8x1xf32> to vector<8x128xf32>
    %14 = arith.addf %7, %13 : vector<8x128xf32>
    %15 = vector.broadcast %12 : vector<1x1xf32> to vector<8x128xf32>
    %16 = arith.addf %14, %15 : vector<8x128xf32>
    %17 = math.log %16 : vector<8x128xf32>
    %18 = arith.subf %3, %17 : vector<8x128xf32>
    %c0_12 = arith.constant 0 : index
    %c0_13 = arith.constant 0 : index
    %19 = vector.load %arg7[%c0_12, %c0_13] : memref<1x1xf32, #tpu.memory_space<vmem>>, vector<1x1xf32>
    %20 = arith.mulf %18, %4 : vector<8x128xf32>
    %21 = vector.shape_cast %20 : vector<8x128xf32> to vector<1x8x128xf32>
    %cst_14 = arith.constant dense<0.000000e+00> : vector<1xf32>
    %22 = vector.multi_reduction <add>, %21, %cst_14 [1, 2] : vector<1x8x128xf32> to vector<1xf32>
    %23 = vector.shape_cast %22 : vector<1xf32> to vector<1x1x1xf32>
    %24 = vector.extract %23[0, 0, 0] : f32 from vector<1x1x1xf32>
    %25 = vector.broadcast %24 : f32 to vector<1x1xf32>
    %26 = arith.addf %19, %25 : vector<1x1xf32>
    %c0_15 = arith.constant 0 : index
    %c0_16 = arith.constant 0 : index
    %27 = vector.load %arg7[%c0_15, %c0_16] : memref<1x1xf32, #tpu.memory_space<vmem>>, vector<1x1xf32>
    tpu.vector_store %arg7[%c0_15, %c0_16], %26 {strides = array<i32>} : memref<1x1xf32, #tpu.memory_space<vmem>>, vector<1x1xf32>,
    %28 = vector.shape_cast %9 : vector<8x1xf32> to vector<1x8x1xf32>
    %cst_17 = arith.constant dense<0.000000e+00> : vector<1xf32>
    %29 = vector.multi_reduction <add>, %28, %cst_17 [1, 2] : vector<1x8x1xf32> to vector<1xf32>
    %30 = vector.shape_cast %29 : vector<1xf32> to vector<1x1x1xf32>
    %31 = vector.extract %30[0, 0, 0] : f32 from vector<1x1x1xf32>
    %32 = vector.broadcast %31 : f32 to vector<1x1xf32>
    %33 = arith.addf %12, %32 : vector<1x1xf32>
    %c0_18 = arith.constant 0 : index
    %c0_19 = arith.constant 0 : index
    %34 = vector.load %arg6[%c0_18, %c0_19] : memref<1x1xf32, #tpu.memory_space<vmem>>, vector<1x1xf32>
    tpu.vector_store %arg6[%c0_18, %c0_19], %33 {strides = array<i32>} : memref<1x1xf32, #tpu.memory_space<vmem>>, vector<1x1xf32>,
    %c0_i32_20 = arith.constant 0 : i32
    %35 = arith.cmpi eq, %arg0, %c0_i32_20 : i32
    %36 = arith.extui %35 : i1 to i32
    %c0_i32_21 = arith.constant 0 : i32
    %37 = arith.cmpi ne, %36, %c0_i32_21 : i32
    scf.if %37 {
      %c0_22 = arith.constant 0 : index
      %c0_23 = arith.constant 0 : index
      %38 = vector.load %arg7[%c0_22, %c0_23] : memref<1x1xf32, #tpu.memory_space<vmem>>, vector<1x1xf32>
      %cst_24 = arith.constant 0.000000e+00 : f32
      %39 = vector.broadcast %cst_24 : f32 to vector<1x1xf32>
      %40 = arith.subf %39, %38 : vector<1x1xf32>
      %cst_25 = arith.constant 1.600000e+01 : f32
      %41 = vector.broadcast %cst_25 : f32 to vector<1x1xf32>
      %42 = arith.divf %40, %41 : vector<1x1xf32>
      %c0_26 = arith.constant 0 : index
      %c0_27 = arith.constant 0 : index
      %43 = vector.load %arg3[%c0_26, %c0_27] : memref<1x1xf32, #tpu.memory_space<vmem>>, vector<1x1xf32>
      tpu.vector_store %arg3[%c0_26, %c0_27], %42 {strides = array<i32>} : memref<1x1xf32, #tpu.memory_space<vmem>>, vector<1x1xf32>,
    } else {
    }
    return
  }
  func.func @transform_0(%arg0: i32) -> (i32, i32) {
    %c0_i32 = arith.constant 0 : i32
    %c0_i32_0 = arith.constant 0 : i32
    return %arg0, %c0_i32 : i32, i32
  }
  func.func @transform_1(%arg0: i32) -> (i32, i32) {
    %c0_i32 = arith.constant 0 : i32
    %c0_i32_0 = arith.constant 0 : i32
    return %arg0, %c0_i32 : i32, i32
  }
  func.func @transform_2(%arg0: i32) -> (i32, i32) {
    %c0_i32 = arith.constant 0 : i32
    %c0_i32_0 = arith.constant 0 : i32
    %c0_i32_1 = arith.constant 0 : i32
    return %c0_i32, %c0_i32_0 : i32, i32
  }
}

</mosaic_0001>

<bundles_post_ra>
// kernel: tpu_custom_call.1
= control target key start
LH: loop header
LB: loop body
LE: loop exit
PB: predicated region body
PF: predicated region fallthrough
CT: control target
= control target key end

     0   :  { %7 = vsyncpa [#allocation7], 0  ;;  %s690_s0 = inlined_call_operand.hbm [shape: f32[8,128], index: 0, kind: input, shape index: {}]   ;;  %s691_s1 = inlined_call_operand.hbm [shape: f32[8,128], index: 1, kind: input, shape index: {}]   ;;  %s692_s2 = inlined_call_operand.hbm [shape: f32[1,1], index: 2, kind: output, shape index: {}]  }
   0x1   :  { %8 = vsyncpa [#allocation10], 0 }
   0x2   :  { %9 = vsyncpa [#allocation8], 0  ;;  %s577_s9 = smov [#allocation6]   ;;  %s578_s11 = smov [#allocation9]  }
   0x3   :  { %s16_s10 = sshll.u32 %s577_s9, 4  ;;  %s26_s12 = sshll.u32 %s578_s11, 4  ;;  %s17_s10 = int_to_ptr.vmem [resolvable:$true] %s16_s10  ;;  %s27_s12 = int_to_ptr.vmem [resolvable:$true] %s26_s12 }
   0x4   :  { %s505_s15 = scalar_lea.hbm %s690_s0, 128 }
   0x5   :  { %p506_p0 = scmp.ne.s32.totalorder %s690_s0, %s505_s15  ;;  %p509_p1 = scmp.lt.u32.totalorder %s505_s15, %s690_s0 }
   0x7   :  { %p511_p2 = pnand %p509_p1, %p506_p0 }
   0x9   :  { %514 = shalt.err (!%p511_p2)
}
   0xa   :  { %s515_s20 = scalar_lea.vmem %s17_s10, 128  ;;  %p520_p4 = scmp.lt.s32.totalorder %s17_s10, %s17_s10 }
   0xb   :  { %p516_p3 = scmp.ne.s32.totalorder %s17_s10, %s515_s20  ;;  %p521_p5 = scmp.lt.s32.totalorder %s515_s20, %s515_s20 }
   0xd   :  { %p522_p6 = por %p521_p5, %p520_p4 }
   0xf   :  { %p523_p7 = pnand %p522_p6, %p516_p3 }
  0x11   :  { %526 = shalt.err (!%p523_p7)
}
  0x12   :  { %19 = dma.hbm_to_vmem [thread:$0]  %s690_s0, 128, %s17_s10, [#allocation7]  }
  0x13   :  { %s527_s25 = scalar_lea.hbm %s691_s1, 128 }
  0x14   :  { %p528_p8 = scmp.ne.s32.totalorder %s691_s1, %s527_s25  ;;  %p531_p9 = scmp.lt.u32.totalorder %s527_s25, %s691_s1 }
  0x16   :  { %p533_p10 = pnand %p531_p9, %p528_p8 }
  0x18   :  { %536 = shalt.err (!%p533_p10)
}
  0x19   :  { %s537_s30 = scalar_lea.vmem %s27_s12, 128  ;;  %p542_p12 = scmp.lt.s32.totalorder %s27_s12, %s27_s12 }
  0x1a   :  { %p538_p11 = scmp.ne.s32.totalorder %s27_s12, %s537_s30  ;;  %p543_p13 = scmp.lt.s32.totalorder %s537_s30, %s537_s30 }
  0x1c   :  { %p544_p0 = por %p543_p13, %p542_p12 }
  0x1e   :  { %p545_p1 = pnand %p544_p0, %p538_p11 }
  0x20   :  { %548 = shalt.err (!%p545_p1)
}
  0x21   :  { %29 = dma.hbm_to_vmem [thread:$0]  %s691_s1, 128, %s27_s12, [#allocation10]  }
  0x22   :  { %571 = dma.done.wait [#allocation7], 128  }
  0x23   :  { %572 = vsyncadd [#allocation7], 4294967168 }
  0x24   :  { %573 = dma.done.wait [#allocation10], 128  }
  0x25   :  { %574 = vsyncadd [#allocation10], 4294967168  ;;  %vm128_vm0 = vcmask 0   ;;  %v579_v0 = vmov 0.0   ;;  %v626_v1 = vld [vmem:[#allocation6] sm:$0xff]  ;;  %v40_v4 = vlaneseq  ;;  %vm126_vm2 = vcmask 64512  }
  0x26   :  { %129 = vst.msk [vmem:[#allocation4] sm:$0x1] %vm128_vm0, %v579_v0  ;;  %423 = vmatprep.subr.mxu0 %v579_v0  ;;  %130 = vst.msk [vmem:[#allocation5] sm:$0x1] %vm128_vm0, %v579_v0  ;;  %v133_v2 = vmul.f32 1.442695, %v626_v1 }
  0x27   :  { %v632_v5 = vshrl.u32 %v40_v4, 7  ;;  %v634_v6 = vand.u32 127, %v40_v4  ;;  %vm580_vm3 = vmmov 0   ;;  %v581_v9 = vmov 0.0|0.0   ;;  %v132_v41 = vld [vmem:[#allocation9] sm:$0xff]  ;;  %s584_s5 = smov [#allocation11]  }
  0x28   :  { %501 = vpow2.f32 %v133_v2  ;;  %425 = vmatprep.mubr.msk.f32.mxu0 %vm580_vm3, %v579_v0  ;;  %460 = vmatprep.mubr.msk.f32.mxu1 %vm580_vm3, %v579_v0  ;;  %v582_v14 = vmov 1.0|1.0   ;;  %v583_v17 = vmov 0   ;;  %s360_s6 = sshll.u32 %s584_s5, 4  ;;  %s361_s6 = int_to_ptr.vmem [resolvable:$true] %s360_s6 }
  0x29   :  { %vm123_vm1 = vcmp.lt.s32.totalorder %v634_v6, %v632_v5  ;;  %v42_v8 = vadd.s32 8, %v632_v5  ;;  %vm59_vm4 = vcmp.le.s32.totalorder %v632_v5, %v634_v6  ;;  %463 = vmatprep.subr.bf16.mxu1 %v581_v9  ;;  %v43_v10 = vadd.s32 16, %v632_v5  ;;  %499 = vset.pattern.permute.xlu0 %v583_v17  ;;  %s549_s7 = scalar_lea.vmem %s361_s6, 16  ;;  %s553_s8 = scalar_lea.vmem %s361_s6, 32 }
  0x2a   :  { %v386_v7 = vsel %vm123_vm1, 1.0, %v579_v0  ;;  %v44_v11 = vadd.s32 24, %v632_v5  ;;  %v45_v12 = vadd.s32 32, %v632_v5  ;;  %v46_v13 = vadd.s32 40, %v632_v5  ;;  %500 = vset.pattern.permute.xlu1 %v583_v17  ;;  %p550_p2 = scmp.ne.s32.totalorder %s361_s6, %s549_s7  ;;  %p554_p3 = scmp.lt.s32.totalorder %s361_s6, %s361_s6 }
  0x2b   :  { %127 = vst.msk [vmem:[#allocation3] sm:$0xff] %vm126_vm2, %v386_v7  ;;  %vm60_vm5 = vcmp.le.s32.totalorder %v42_v8, %v634_v6  ;;  %vm61_vm7 = vcmp.le.s32.totalorder %v43_v10, %v634_v6  ;;  %v47_v15 = vadd.s32 48, %v632_v5  ;;  %v48_v16 = vadd.s32 56, %v632_v5  ;;  %p555_p4 = scmp.lt.s32.totalorder %s553_s8, %s549_s7 }
  0x2c   :  { %vm464_vm6 = vmpackc.low %vm60_vm5, %vm59_vm4  ;;  %vm62_vm8 = vcmp.le.s32.totalorder %v44_v11, %v634_v6  ;;  %vm63_vm10 = vcmp.le.s32.totalorder %v45_v12, %v634_v6  ;;  %vm64_vm11 = vcmp.le.s32.totalorder %v46_v13, %v634_v6  ;;  %v49_v18 = vadd.s32 64, %v632_v5 }
  0x2d   :  { %465 = vmatpush3.bf16.msk.msra.mxu1 %vm464_vm6, %v582_v14  ;;  %vm467_vm9 = vmpackc.low %vm62_vm8, %vm61_vm7  ;;  %vm65_vm13 = vcmp.le.s32.totalorder %v47_v15, %v634_v6  ;;  %vm66_vm14 = vcmp.le.s32.totalorder %v48_v16, %v634_v6  ;;  %v50_v19 = vadd.s32 72, %v632_v5  ;;  %v51_v20 = vadd.s32 80, %v632_v5  ;;  %v228_v29 = vld [vmem:[#allocation4] sm:$0x1]  ;;  %v317_v59 = vld [vmem:[#allocation5] sm:$0x1]  ;;  %p556_p5 = por %p555_p4, %p554_p3 }
  0x2e   :  { %466 = vmatprep.subr.bf16.mxu1 %v581_v9  ;;  %vm470_vm12 = vmpackc.low %vm64_vm11, %vm63_vm10  ;;  %vm67_vm1 = vcmp.le.s32.totalorder %v49_v18, %v634_v6  ;;  %v52_v21 = vadd.s32 88, %v632_v5  ;;  %v53_v22 = vadd.s32 96, %v632_v5  ;;  %v54_v23 = vadd.s32 104, %v632_v5 }
  0x2f   :  { %vm473_vm15 = vmpackc.low %vm66_vm14, %vm65_vm13  ;;  %vm68_vm3 = vcmp.le.s32.totalorder %v50_v19, %v634_v6  ;;  %vm69_vm5 = vcmp.le.s32.totalorder %v51_v20, %v634_v6  ;;  %v55_v24 = vadd.s32 112, %v632_v5  ;;  %v56_v25 = vadd.s32 120, %v632_v5  ;;  %p557_p6 = pnand %p556_p5, %p550_p2 }
  0x30   :  { %vm476_vm4 = vmpackc.low %vm68_vm3, %vm67_vm1  ;;  %vm70_vm6 = vcmp.le.s32.totalorder %v52_v21, %v634_v6  ;;  %vm71_vm8 = vcmp.le.s32.totalorder %v53_v22, %v634_v6  ;;  %v307_v28 = vsub.s32 0, %v632_v5 }
  0x31   :  { %468 = vmatpush3.bf16.msk.msra.mxu1 %vm467_vm9, %v582_v14  ;;  %vm479_vm7 = vmpackc.low %vm70_vm6, %vm69_vm5  ;;  %vm72_vm9 = vcmp.le.s32.totalorder %v54_v23, %v634_v6  ;;  %vm73_vm11 = vcmp.le.s32.totalorder %v55_v24, %v634_v6 }
  0x32   :  { %v629_v3 = vpop.eup %501  ;;  %469 = vmatprep.subr.bf16.mxu1 %v581_v9  ;;  %vm482_vm10 = vmpackc.low %vm72_vm9, %vm71_vm8  ;;  %v153_v26 = vld [vmem:[#allocation3] sm:$0xff]  ;;  %v308_v30 = vrot.slane %v228_v29, %v307_v28 }
  0x33   :  { %151 = vadd.xlane.f32.xlu0 %v629_v3 }
  0x34   :  { %310 = vperm.xlu1 %500, %v308_v30  }
  0x35   :  { %471 = vmatpush3.bf16.msk.msra.mxu1 %vm470_vm12, %v582_v14  ;;  %vm74_vm12 = vcmp.le.s32.totalorder %v56_v25, %v634_v6 }
  0x36   :  { %472 = vmatprep.subr.bf16.mxu1 %v581_v9  ;;  %vm485_vm13 = vmpackc.low %vm74_vm12, %vm73_vm11 }
  0x39   :  { %474 = vmatpush3.bf16.msk.msra.mxu1 %vm473_vm15, %v582_v14 }
  0x3a   :  { %475 = vmatprep.subr.bf16.mxu1 %v581_v9 }
  0x3d   :  { %477 = vmatpush3.bf16.msk.msra.mxu1 %vm476_vm4, %v582_v14 }
  0x3e   :  { %478 = vmatprep.subr.bf16.mxu1 %v581_v9 }
  0x41   :  { %480 = vmatpush3.bf16.msk.msra.mxu1 %vm479_vm7, %v582_v14 }
  0x42   :  { %481 = vmatprep.subr.bf16.mxu1 %v581_v9 }
  0x45   :  { %483 = vmatpush3.bf16.msk.msra.mxu1 %vm482_vm10, %v582_v14 }
  0x46   :  { %484 = vmatprep.subr.bf16.mxu1 %v581_v9 }
  0x49   :  { %486 = vmatpush3.bf16.msk.msra.mxu1 %vm485_vm13, %v582_v14 }
  0x4c   :  { %461 = vmatmul.mubr.f32.vlgmr.msra.gmra.mrb[0].mxu1 %v629_v3 }
  0xb3   :  { %v311_v36 = vpop.permute.xlu1 %310 }
  0xc0   :  { %v152_v27 = vpop.xlane.xlu0 %151 }
  0xc1   :  { %424 = vmatpush3.msra.mxu0 %v152_v27 }
  0xc2   :  { %426 = vmatmul.mubr.msk.f32.vlgmr.msra.gmra.mrb[0].mxu0 %vm126_vm2, %v153_v26  ;;  %vm332_vm2 = vcmask 7168  }
  0xc3   :  { %v333_v44 = vsel %vm332_vm2, %v152_v27, 0.0 }
 0x11f   :  { %v300_v31 = vpop.f32.mrb[0].mxu1 }
 0x120   :  { %v462_v32 = vpop.f32.mrb[1].mxu1 }
 0x195   :  { %v224_v33 = vpop.f32.mrb[0].mxu0 }
 0x196   :  { %231 = vperm.xlu0 %499, %v224_v33   ;;  %v427_v34 = vpop.f32.mrb[1].mxu0 }
 0x215   :  { %v232_v35 = vpop.permute.xlu0 %231 }
 0x216   :  { %v301_v37 = vadd.f32 %v300_v31, %v232_v35 }
 0x218   :  { %v313_v38 = vadd.f32 %v311_v36, %v301_v37 }
 0x21a   :  { %503 = vlog2.f32 %v313_v38 }
 0x224   :  { %v504_v39 = vpop.eup %503 }
 0x225   :  { %v315_v40 = vmul.f32 0.6931472, %v504_v39 }
 0x227   :  { %v316_v42 = vsub.f32 %v626_v1, %v315_v40 }
 0x229   :  { %v318_v43 = vmul.f32 %v316_v42, %v132_v41 }
 0x22b   :  { %319 = vadd.xlane.f32.xlu1 %v318_v43 }
 0x22f   :  { %334 = vadd.xlane.f32.xlu1 %v333_v44 }
 0x2b8   :  { %v320_v45 = vpop.xlane.xlu1 %319 }
 0x2b9   :  { %v321_v46 = vrot.slane %v320_v45, 4 }
 0x2bb   :  { %v322_v47 = vadd.f32 %v321_v46, %v320_v45 }
 0x2bc   :  { %v335_v48 = vpop.xlane.xlu1 %334 }
 0x2bd   :  { %v323_v49 = vrot.slane %v322_v47, 2  ;;  %v336_v50 = vrot.slane %v335_v48, 4 }
 0x2bf   :  { %v337_v51 = vadd.f32 %v336_v50, %v335_v48  ;;  %v324_v52 = vadd.f32 %v323_v49, %v322_v47 }
 0x2c1   :  { %v338_v53 = vrot.slane %v337_v51, 2  ;;  %v325_v54 = vrot.slane %v324_v52, 1 }
 0x2c3   :  { %v339_v55 = vadd.f32 %v338_v53, %v337_v51  ;;  %v326_v56 = vadd.f32 %v325_v54, %v324_v52 }
 0x2c5   :  { %487 = vpush %v326_v56  ;;  %v340_v57 = vrot.slane %v339_v55, 1 }
 0x2c7   :  { %v341_v58 = vadd.f32 %v340_v57, %v339_v55 }
 0x2c9   :  { %489 = vpush %v341_v58 }
 0x2f6   :  { %s488_s1 = spop %487 }
 0x2f7   :  { %v328_v60 = vstv %s488_s1 }
 0x2f8   :  { %v329_v61 = vadd.f32 %v328_v60, %v317_v59 }
 0x2fa   :  { %331 = vst.msk [vmem:[#allocation5] sm:$0x1] %vm128_vm0, %v329_v61  ;;  %s490_s4 = spop %489 }
 0x2fb   :  { %v343_v62 = vstv %s490_s4 }
 0x2fc   :  { %v344_v63 = vadd.f32 %v343_v62, %v228_v29 }
 0x2fe   :  { %345 = vst.msk [vmem:[#allocation4] sm:$0x1] %vm128_vm0, %v344_v63 }
 0x301   :  { %v349_v0 = vld [vmem:[#allocation5] sm:$0x1] }
 0x302   :  { %v350_v1 = vsub.f32 0.0, %v349_v0 }
 0x304   :  { %v352_v2 = vmul.f32 0.0625, %v350_v1 }
 0x306   :  { %353 = vst.msk [vmem:[#allocation11] sm:$0x1] %vm128_vm0, %v352_v2 }
 0x307   :  { %560 = shalt.err (!%p557_p6)
}
 0x308   :  { %s561_s11 = scalar_lea.hbm %s692_s2, 16 }
 0x309   :  { %p562_p7 = scmp.ne.s32.totalorder %s692_s2, %s561_s11  ;;  %p565_p8 = scmp.lt.u32.totalorder %s561_s11, %s692_s2 }
 0x30b   :  { %p567_p9 = pnand %p565_p8, %p562_p7 }
 0x30d   :  { %570 = shalt.err (!%p567_p9)
}
 0x30e   :  { %363 = dma.vmem_to_hbm [thread:$0]  %s361_s6, 16, %s692_s2, [#allocation8]  }
 0x30f   :  { %575 = dma.done.wait [#allocation8], 16  }
 0x310   :  { %576 = vsyncadd [#allocation8], 4294967280 }
 0x311   :  { %367 = vsyncpa [#allocation7], 1 }
 0x312   :  { %368 = vsyncpa [#allocation10], 1 }
 0x313   :  { %369 = vsyncpa [#allocation8], 1 }

</bundles_post_ra>
